<compile_context>
chip_gen: v7x
topology: tpu7x:2x2x1
jax: 0.10.0
libtpu: 0.0.40
codegen_flags: <defaults>
</compile_context>

<pallas_src>
import functools

import jax
import jax.numpy as jnp
from jax.experimental import pallas as pl
from jax.experimental.pallas import tpu as pltpu


def _round_up(x, m):
    return ((x + m - 1) // m) * m


def _pick_tile(dim, align, cap):
    """dim is a multiple of `align`; return the largest multiple of `align` that is
    <= cap and divides `dim` exactly (so no zero-padded tiles are ever streamed)."""
    t = min(cap, dim)
    t -= t % align
    while dim % t:
        t -= align
    return t


def _select_operand_dtype():
    """int8 on v5*/v6* (integer MXU path: half the operand bytes, exact for 0/±1);
    bf16 otherwise (v7x has no integer MXU)."""
    try:
        kind = jax.devices()[0].device_kind.lower()
    except Exception:
        return jnp.bfloat16
    if "v5" in kind or "v6" in kind:
        return jnp.int8
    return jnp.bfloat16


def _fused_kernel(xr_ref, xi_ref, ur_ref, ui_ref, br_ref, bi_ref,
                  out_r_ref, out_i_ref, acc_r_ref, acc_i_ref):
    """Per (i, j, k) tile: 4 MXU dots into two accumulators; bias folded into init;
    threshold + narrow-dtype store at the last k step."""
    k = pl.program_id(2)
    acc_t = acc_r_ref.dtype

    @pl.when(k == 0)
    def _init():
        # Integer correction terms (threshold already folded in) seed the accumulators.
        acc_r_ref[...] = jnp.broadcast_to(br_ref[...], acc_r_ref.shape)
        acc_i_ref[...] = jnp.broadcast_to(bi_ref[...], acc_i_ref.shape)

    xr = xr_ref[...]
    xi = xi_ref[...]
    ur = ur_ref[...]
    ui = ui_ref[...]
    acc_r_ref[...] += (jnp.dot(xr, ur, preferred_element_type=acc_t)
                       - jnp.dot(xi, ui, preferred_element_type=acc_t))
    acc_i_ref[...] += (jnp.dot(xr, ui, preferred_element_type=acc_t)
                       + jnp.dot(xi, ur, preferred_element_type=acc_t))

    @pl.when(k == pl.num_programs(2) - 1)
    def _finalize():
        out_r_ref[...] = (acc_r_ref[...] >= 0).astype(out_r_ref.dtype)
        out_i_ref[...] = (acc_i_ref[...] >= 0).astype(out_i_ref.dtype)


@functools.partial(jax.jit, static_argnames=("operand_dtype",))
def _forward(input_r, input_i, wr_bit_t, wi_bit_t, *, operand_dtype):
    """input_r/input_i: (B, IN) 0/1 float bits; w*_bit_t: (IN, OUT) 0/1 float bits.
    Returns (out_r, out_i): (B, OUT) float32 in {0., 1.}."""
    batch, in_features = input_r.shape
    out_features = wr_bit_t.shape[1]

    use_int = jnp.issubdtype(operand_dtype, jnp.integer)
    acc_dtype = jnp.int32 if use_int else jnp.float32
    m_align = 32 if use_int else 16      # int8 packs 4x deeper along sublanes
    out_dtype = jnp.bfloat16             # outputs are 0/1 — exact, half the store bytes

    # ---- wrapper-side algebraic rewrite (small weight-sized work; could be cached
    # across forward calls when the weight bit-plane is reused) ----
    swr = jnp.sum(wr_bit_t, axis=0)                           # (OUT,)
    swi = jnp.sum(wi_bit_t, axis=0)
    bias_r = (swi - swr).astype(acc_dtype)                    # integer-valued
    bias_i = (in_features - swr - swi).astype(acc_dtype)
    ur = (2.0 * wr_bit_t - 1.0).astype(operand_dtype)         # ±1, exact in bf16/int8
    ui = (2.0 * wi_bit_t - 1.0).astype(operand_dtype)

    # ---- minimal alignment padding only (never padded up to the tile) ----
    m_pad = _round_up(batch, m_align)
    k_pad = _round_up(in_features, 128)
    n_pad = _round_up(out_features, 128)

    def pad2(a, rows, cols, dtype):
        return jnp.pad(a, ((0, rows - a.shape[0]), (0, cols - a.shape[1]))).astype(dtype)

    xr = pad2(input_r, m_pad, k_pad, operand_dtype)
    xi = pad2(input_i, m_pad, k_pad, operand_dtype)
    ur = pad2(ur, k_pad, n_pad, operand_dtype)
    ui = pad2(ui, k_pad, n_pad, operand_dtype)
    br = jnp.pad(bias_r, (0, n_pad - out_features)).reshape(1, n_pad)
    bi = jnp.pad(bias_i, (0, n_pad - out_features)).reshape(1, n_pad)

    # ---- tiles: exact divisors of the 128-rounded dims; working set ~<= 8 MiB so it
    # fits the default scoped VMEM on every generation (incl. v7x's 64 MiB chip). ----
    tm = _pick_tile(m_pad, m_align, 256)
    tk = _pick_tile(k_pad, 128, 1024)
    tn = _pick_tile(n_pad, 128, 512)
    grid = (m_pad // tm, n_pad // tn, k_pad // tk)

    out_r, out_i = pl.pallas_call(
        _fused_kernel,
        out_shape=(jax.ShapeDtypeStruct((m_pad, n_pad), out_dtype),
                   jax.ShapeDtypeStruct((m_pad, n_pad), out_dtype)),
        grid_spec=pltpu.PrefetchScalarGridSpec(
            num_scalar_prefetch=0,
            grid=grid,
            in_specs=[
                pl.BlockSpec((tm, tk), lambda i, j, k: (i, k)),   # Xr
                pl.BlockSpec((tm, tk), lambda i, j, k: (i, k)),   # Xi
                pl.BlockSpec((tk, tn), lambda i, j, k: (k, j)),   # Ur
                pl.BlockSpec((tk, tn), lambda i, j, k: (k, j)),   # Ui
                pl.BlockSpec((1, tn), lambda i, j, k: (0, j)),    # bias_r
                pl.BlockSpec((1, tn), lambda i, j, k: (0, j)),    # bias_i
            ],
            out_specs=[
                pl.BlockSpec((tm, tn), lambda i, j, k: (i, j)),
                pl.BlockSpec((tm, tn), lambda i, j, k: (i, j)),
            ],
            scratch_shapes=[pltpu.VMEM((tm, tn), acc_dtype),
                            pltpu.VMEM((tm, tn), acc_dtype)],
        ),
        compiler_params=pltpu.CompilerParams(
            dimension_semantics=("parallel", "parallel", "arbitrary")),
    )(xr, xi, ur, ui, br, bi)

    out_r = out_r[:batch, :out_features].astype(jnp.float32)
    out_i = out_i[:batch, :out_features].astype(jnp.float32)
    return out_r, out_i


def unary_linear_complex(input_r, input_i, wr_bit_t, wi_bit_t, operand_dtype=None):
    """Public entry. Auto-selects the narrow operand dtype per chip generation, with a
    guaranteed bf16 fallback if the integer MXU path is unavailable on this backend."""
    if operand_dtype is None:
        operand_dtype = _select_operand_dtype()
    if operand_dtype != jnp.bfloat16:
        try:
            out = _forward(input_r, input_i, wr_bit_t, wi_bit_t,
                           operand_dtype=operand_dtype)
            jax.block_until_ready(out)
            return out
        except Exception:
            pass  # fall back to the universally-supported bf16 MXU path
    return _forward(input_r, input_i, wr_bit_t, wi_bit_t, operand_dtype=jnp.bfloat16)


def _make_weight_bits(key, out_features, in_features, bitwidth=8):
    """SourceGen(mode='bipolar') + BSGen at rng_idx=0 with Sobol rng (rng[0] == 0)."""
    seq_len = 2 ** bitwidth
    w = jax.random.uniform(key, (out_features, in_features),
                           minval=-1.0, maxval=1.0, dtype=jnp.float32)
    buf = jnp.round((w + 1.0) / 2.0 * seq_len)     # SourceGen bipolar binary source
    rng0 = jnp.float32(0.0)                        # Sobol sequence first element is 0
    bits = (buf > rng0).astype(jnp.float32)        # BSGen at index 0
    return bits                                    # (out, in)


def _reference(input_r, input_i, wr_bit, wi_bit):
    """Plain-JAX reference of the ORIGINAL eight-matmul formulation (exact: every term
    is a small integer and the threshold compares a half-integer against 0)."""
    in_features = input_r.shape[1]
    offset = (in_features * 2 - 1) / 2.0
    A = input_r @ wr_bit.T + (1 - input_r) @ (1 - wr_bit).T
    B = input_r @ wi_bit.T + (1 - input_r) @ (1 - wi_bit).T
    C = input_i @ wr_bit.T + (1 - input_i) @ (1 - wr_bit).T
    D = (1 - input_i) @ wi_bit.T + input_i @ (1 - wi_bit).T
    ref_r = ((A + D - offset) > 0).astype(jnp.float32)
    ref_i = ((B + C - offset) > 0).astype(jnp.float32)
    return ref_r, ref_i


if __name__ == "__main__":
    key = jax.random.PRNGKey(0)

    def make_case(case_key, batch, in_features, out_features, bitwidth=8):
        k_wr, k_wi, k_xr, k_xi = jax.random.split(case_key, 4)
        wr_bit = _make_weight_bits(k_wr, out_features, in_features, bitwidth)  # (out, in)
        wi_bit = _make_weight_bits(k_wi, out_features, in_features, bitwidth)  # (out, in)
        xr = jax.random.bernoulli(k_xr, 0.5, (batch, in_features)).astype(jnp.float32)
        xi = jax.random.bernoulli(k_xi, 0.5, (batch, in_features)).astype(jnp.float32)
        return xr, xi, wr_bit, wi_bit

    k1, k2 = jax.random.split(key)
    cases = [
        # small, single-tile case (module-scale example)
        ("small_single_tile", make_case(k1, 4, 32, 16)),
        # ragged multi-tile case: multiple K accumulation steps, multiple N tiles,
        # and M/K/N that are not multiples of the tile sizes (exercises padding paths)
        ("multi_tile_ragged", make_case(k2, 37, 1100, 600)),
    ]

    for name, (input_r, input_i, wr_bit, wi_bit) in cases:
        out_r, out_i = unary_linear_complex(input_r, input_i, wr_bit.T, wi_bit.T)
        jax.block_until_ready((out_r, out_i))

        ref_r, ref_i = _reference(input_r, input_i, wr_bit, wi_bit)
        assert out_r.shape == ref_r.shape and out_r.dtype == jnp.float32, name
        assert out_i.shape == ref_i.shape and out_i.dtype == jnp.float32, name
        assert bool(jnp.all(out_r == ref_r)), f"{name}: real output mismatch"
        assert bool(jnp.all(out_i == ref_i)), f"{name}: imag output mismatch"

    print("KERNEL_OK")
</pallas_src>

<mosaic_0001>
module attributes {stable_mosaic.version = 11 : i64} {
  func.func @_fused_kernel(%arg0: i32, %arg1: i32, %arg2: i32, %arg3: memref<16x128xbf16, #tpu.memory_space<vmem>>, %arg4: memref<16x128xbf16, #tpu.memory_space<vmem>>, %arg5: memref<128x128xbf16, #tpu.memory_space<vmem>>, %arg6: memref<128x128xbf16, #tpu.memory_space<vmem>>, %arg7: memref<1x128xf32, #tpu.memory_space<vmem>>, %arg8: memref<1x128xf32, #tpu.memory_space<vmem>>, %arg9: memref<16x128xbf16, #tpu.memory_space<vmem>>, %arg10: memref<16x128xbf16, #tpu.memory_space<vmem>>, %arg11: memref<16x128xf32, #tpu.memory_space<vmem>>, %arg12: memref<16x128xf32, #tpu.memory_space<vmem>>) attributes {dimension_semantics = [#tpu.dimension_semantics<parallel>, #tpu.dimension_semantics<parallel>, #tpu.dimension_semantics<arbitrary>], iteration_bounds = array<i64: 1, 1, 1>, scalar_prefetch = 0 : i64, scratch_operands = 2 : i64, tpu.core_type = #tpu.core_type<tc>, window_params = [{transform_indices = @transform_0, window_bounds = array<i64: 16, 128>}, {transform_indices = @transform_1, window_bounds = array<i64: 16, 128>}, {transform_indices = @transform_2, window_bounds = array<i64: 128, 128>}, {transform_indices = @transform_3, window_bounds = array<i64: 128, 128>}, {transform_indices = @transform_4, window_bounds = array<i64: 1, 128>}, {transform_indices = @transform_5, window_bounds = array<i64: 1, 128>}, {transform_indices = @transform_6, window_bounds = array<i64: 16, 128>}, {transform_indices = @transform_7, window_bounds = array<i64: 16, 128>}]} {
    %c0_i32 = arith.constant 0 : i32
    %0 = arith.cmpi eq, %arg2, %c0_i32 : i32
    %1 = arith.extui %0 : i1 to i32
    %c0_i32_0 = arith.constant 0 : i32
    %2 = arith.cmpi ne, %1, %c0_i32_0 : i32
    scf.if %2 {
      %c0_21 = arith.constant 0 : index
      %c0_22 = arith.constant 0 : index
      %22 = vector.load %arg7[%c0_21, %c0_22] : memref<1x128xf32, #tpu.memory_space<vmem>>, vector<1x128xf32>
      %23 = vector.shape_cast %22 : vector<1x128xf32> to vector<1x128xf32>
      %24 = vector.broadcast %23 : vector<1x128xf32> to vector<16x128xf32>
      %c0_23 = arith.constant 0 : index
      %c0_24 = arith.constant 0 : index
      %25 = vector.load %arg11[%c0_23, %c0_24] : memref<16x128xf32, #tpu.memory_space<vmem>>, vector<16x128xf32>
      tpu.vector_store %arg11[%c0_23, %c0_24], %24 {strides = array<i32>} : memref<16x128xf32, #tpu.memory_space<vmem>>, vector<16x128xf32>,
      %c0_25 = arith.constant 0 : index
      %c0_26 = arith.constant 0 : index
      %26 = vector.load %arg8[%c0_25, %c0_26] : memref<1x128xf32, #tpu.memory_space<vmem>>, vector<1x128xf32>
      %27 = vector.shape_cast %26 : vector<1x128xf32> to vector<1x128xf32>
      %28 = vector.broadcast %27 : vector<1x128xf32> to vector<16x128xf32>
      %c0_27 = arith.constant 0 : index
      %c0_28 = arith.constant 0 : index
      %29 = vector.load %arg12[%c0_27, %c0_28] : memref<16x128xf32, #tpu.memory_space<vmem>>, vector<16x128xf32>
      tpu.vector_store %arg12[%c0_27, %c0_28], %28 {strides = array<i32>} : memref<16x128xf32, #tpu.memory_space<vmem>>, vector<16x128xf32>,
    } else {
    }
    %c0 = arith.constant 0 : index
    %c0_1 = arith.constant 0 : index
    %3 = vector.load %arg3[%c0, %c0_1] : memref<16x128xbf16, #tpu.memory_space<vmem>>, vector<16x128xbf16>
    %c0_2 = arith.constant 0 : index
    %c0_3 = arith.constant 0 : index
    %4 = vector.load %arg4[%c0_2, %c0_3] : memref<16x128xbf16, #tpu.memory_space<vmem>>, vector<16x128xbf16>
    %c0_4 = arith.constant 0 : index
    %c0_5 = arith.constant 0 : index
    %5 = vector.load %arg5[%c0_4, %c0_5] : memref<128x128xbf16, #tpu.memory_space<vmem>>, vector<128x128xbf16>
    %c0_6 = arith.constant 0 : index
    %c0_7 = arith.constant 0 : index
    %6 = vector.load %arg6[%c0_6, %c0_7] : memref<128x128xbf16, #tpu.memory_space<vmem>>, vector<128x128xbf16>
    %c0_8 = arith.constant 0 : index
    %c0_9 = arith.constant 0 : index
    %7 = vector.load %arg11[%c0_8, %c0_9] : memref<16x128xf32, #tpu.memory_space<vmem>>, vector<16x128xf32>
    %cst = arith.constant dense<0.000000e+00> : vector<16x128xf32>
    %8 = tpu.matmul %3, %5, %cst {dimension_numbers = #tpu.dot_dimension_numbers<[1], [0], [0], [1], [0, 0, 1, 1], [], []>} : vector<16x128xbf16>, vector<128x128xbf16>, vector<16x128xf32> -> vector<16x128xf32>
    %cst_10 = arith.constant dense<0.000000e+00> : vector<16x128xf32>
    %9 = tpu.matmul %4, %6, %cst_10 {dimension_numbers = #tpu.dot_dimension_numbers<[1], [0], [0], [1], [0, 0, 1, 1], [], []>} : vector<16x128xbf16>, vector<128x128xbf16>, vector<16x128xf32> -> vector<16x128xf32>
    %10 = arith.subf %8, %9 : vector<16x128xf32>
    %11 = arith.addf %7, %10 : vector<16x128xf32>
    %c0_11 = arith.constant 0 : index
    %c0_12 = arith.constant 0 : index
    %12 = vector.load %arg11[%c0_11, %c0_12] : memref<16x128xf32, #tpu.memory_space<vmem>>, vector<16x128xf32>
    tpu.vector_store %arg11[%c0_11, %c0_12], %11 {strides = array<i32>} : memref<16x128xf32, #tpu.memory_space<vmem>>, vector<16x128xf32>,
    %c0_13 = arith.constant 0 : index
    %c0_14 = arith.constant 0 : index
    %13 = vector.load %arg12[%c0_13, %c0_14] : memref<16x128xf32, #tpu.memory_space<vmem>>, vector<16x128xf32>
    %cst_15 = arith.constant dense<0.000000e+00> : vector<16x128xf32>
    %14 = tpu.matmul %3, %6, %cst_15 {dimension_numbers = #tpu.dot_dimension_numbers<[1], [0], [0], [1], [0, 0, 1, 1], [], []>} : vector<16x128xbf16>, vector<128x128xbf16>, vector<16x128xf32> -> vector<16x128xf32>
    %cst_16 = arith.constant dense<0.000000e+00> : vector<16x128xf32>
    %15 = tpu.matmul %4, %5, %cst_16 {dimension_numbers = #tpu.dot_dimension_numbers<[1], [0], [0], [1], [0, 0, 1, 1], [], []>} : vector<16x128xbf16>, vector<128x128xbf16>, vector<16x128xf32> -> vector<16x128xf32>
    %16 = arith.addf %14, %15 : vector<16x128xf32>
    %17 = arith.addf %13, %16 : vector<16x128xf32>
    %c0_17 = arith.constant 0 : index
    %c0_18 = arith.constant 0 : index
    %18 = vector.load %arg12[%c0_17, %c0_18] : memref<16x128xf32, #tpu.memory_space<vmem>>, vector<16x128xf32>
    tpu.vector_store %arg12[%c0_17, %c0_18], %17 {strides = array<i32>} : memref<16x128xf32, #tpu.memory_space<vmem>>, vector<16x128xf32>,
    %c0_i32_19 = arith.constant 0 : i32
    %19 = arith.cmpi eq, %arg2, %c0_i32_19 : i32
    %20 = arith.extui %19 : i1 to i32
    %c0_i32_20 = arith.constant 0 : i32
    %21 = arith.cmpi ne, %20, %c0_i32_20 : i32
    scf.if %21 {
      %c0_21 = arith.constant 0 : index
      %c0_22 = arith.constant 0 : index
      %22 = vector.load %arg11[%c0_21, %c0_22] : memref<16x128xf32, #tpu.memory_space<vmem>>, vector<16x128xf32>
      %cst_23 = arith.constant 0.000000e+00 : f32
      %23 = vector.broadcast %cst_23 : f32 to vector<16x128xf32>
      %24 = arith.cmpf oge, %22, %23 : vector<16x128xf32>
      %25 = arith.extui %24 : vector<16x128xi1> to vector<16x128xi32>
      %26 = arith.sitofp %25 : vector<16x128xi32> to vector<16x128xf32>
      %27 = arith.truncf %26 : vector<16x128xf32> to vector<16x128xbf16>
      %c0_24 = arith.constant 0 : index
      %c0_25 = arith.constant 0 : index
      %28 = vector.load %arg9[%c0_24, %c0_25] : memref<16x128xbf16, #tpu.memory_space<vmem>>, vector<16x128xbf16>
      tpu.vector_store %arg9[%c0_24, %c0_25], %27 {strides = array<i32>} : memref<16x128xbf16, #tpu.memory_space<vmem>>, vector<16x128xbf16>,
      %c0_26 = arith.constant 0 : index
      %c0_27 = arith.constant 0 : index
      %29 = vector.load %arg12[%c0_26, %c0_27] : memref<16x128xf32, #tpu.memory_space<vmem>>, vector<16x128xf32>
      %cst_28 = arith.constant 0.000000e+00 : f32
      %30 = vector.broadcast %cst_28 : f32 to vector<16x128xf32>
      %31 = arith.cmpf oge, %29, %30 : vector<16x128xf32>
      %32 = arith.extui %31 : vector<16x128xi1> to vector<16x128xi32>
      %33 = arith.sitofp %32 : vector<16x128xi32> to vector<16x128xf32>
      %34 = arith.truncf %33 : vector<16x128xf32> to vector<16x128xbf16>
      %c0_29 = arith.constant 0 : index
      %c0_30 = arith.constant 0 : index
      %35 = vector.load %arg10[%c0_29, %c0_30] : memref<16x128xbf16, #tpu.memory_space<vmem>>, vector<16x128xbf16>
      tpu.vector_store %arg10[%c0_29, %c0_30], %34 {strides = array<i32>} : memref<16x128xbf16, #tpu.memory_space<vmem>>, vector<16x128xbf16>,
    } else {
    }
    return
  }
  func.func @transform_0(%arg0: i32, %arg1: i32, %arg2: i32) -> (i32, i32) {
    %c0_i32 = arith.constant 0 : i32
    return %arg0, %arg2 : i32, i32
  }
  func.func @transform_1(%arg0: i32, %arg1: i32, %arg2: i32) -> (i32, i32) {
    %c0_i32 = arith.constant 0 : i32
    return %arg0, %arg2 : i32, i32
  }
  func.func @transform_2(%arg0: i32, %arg1: i32, %arg2: i32) -> (i32, i32) {
    %c0_i32 = arith.constant 0 : i32
    return %arg2, %arg1 : i32, i32
  }
  func.func @transform_3(%arg0: i32, %arg1: i32, %arg2: i32) -> (i32, i32) {
    %c0_i32 = arith.constant 0 : i32
    return %arg2, %arg1 : i32, i32
  }
  func.func @transform_4(%arg0: i32, %arg1: i32, %arg2: i32) -> (i32, i32) {
    %c0_i32 = arith.constant 0 : i32
    %c0_i32_0 = arith.constant 0 : i32
    return %c0_i32, %arg1 : i32, i32
  }
  func.func @transform_5(%arg0: i32, %arg1: i32, %arg2: i32) -> (i32, i32) {
    %c0_i32 = arith.constant 0 : i32
    %c0_i32_0 = arith.constant 0 : i32
    return %c0_i32, %arg1 : i32, i32
  }
  func.func @transform_6(%arg0: i32, %arg1: i32, %arg2: i32) -> (i32, i32) {
    %c0_i32 = arith.constant 0 : i32
    return %arg0, %arg1 : i32, i32
  }
  func.func @transform_7(%arg0: i32, %arg1: i32, %arg2: i32) -> (i32, i32) {
    %c0_i32 = arith.constant 0 : i32
    return %arg0, %arg1 : i32, i32
  }
}

</mosaic_0001>

<bundles_post_ra>
// kernel: _forward.1
= control target key start
LH: loop header
LB: loop body
LE: loop exit
PB: predicated region body
PF: predicated region fallthrough
CT: control target
= control target key end

     0   :  { %v591_v0 = vmov 0.0   ;;  %vm592_vm0 = vmmov 0   ;;  %s743_s2 = inlined_call_operand.vmem [shape: bf16[128,128], index: 2, kind: input, shape index: {}]   ;;  %s744_s3 = inlined_call_operand.vmem [shape: bf16[128,128], index: 3, kind: input, shape index: {}]   ;;  %s745_s0 = inlined_call_operand.vmem [shape: bf16[16,128], index: 0, kind: input, shape index: {}]   ;;  %s746_s1 = inlined_call_operand.vmem [shape: bf16[16,128], index: 1, kind: input, shape index: {}]   ;;  %s747_s4 = inlined_call_operand.vmem [shape: f32[1,128], index: 4, kind: input, shape index: {}]   ;;  %s748_s6 = inlined_call_operand.vmem [shape: bf16[16,128], index: 6, kind: output, shape index: {0}]   ;;  %s749_s5 = inlined_call_operand.vmem [shape: f32[1,128], index: 5, kind: input, shape index: {}]   ;;  %s750_s7 = inlined_call_operand.vmem [shape: bf16[16,128], index: 7, kind: output, shape index: {1}]  }
   0x1   :  { %491 = vmatprep.subr.bf16.mxu0 %v591_v0  ;;  %511 = vmatprep.subr.bf16.mxu1 %v591_v0  ;;  %v573_v1 = vld [vmem:[%s743_s2] sm:$0xff]   ;;  %v575_v3 = vld [vmem:[%s743_s2 + $0x8] sm:$0xff]   ;;  %v577_v5 = vld [vmem:[%s743_s2 + $0x10] sm:$0xff]  }
   0x2   :  { %v574_v2 = vld [vmem:[%s744_s3] sm:$0xff]   ;;  %507 = vmatprep.mubr.msk.bf16.mxu0 %vm592_vm0, %v591_v0  ;;  %527 = vmatprep.mubr.msk.bf16.mxu1 %vm592_vm0, %v591_v0  ;;  %v576_v4 = vld [vmem:[%s744_s3 + $0x8] sm:$0xff]   ;;  %v578_v6 = vld [vmem:[%s744_s3 + $0x10] sm:$0xff]  }
   0x3   :  { %492 = vmatpush3.bf16.msra.mxu0 %v573_v1  ;;  %512 = vmatpush3.bf16.msra.mxu1 %v574_v2  ;;  %v579_v7 = vld [vmem:[%s743_s2 + $0x18] sm:$0xff]   ;;  %v581_v9 = vld [vmem:[%s743_s2 + $0x20] sm:$0xff]   ;;  %v583_v11 = vld [vmem:[%s743_s2 + $0x28] sm:$0xff]  }
   0x4   :  { %493 = vmatprep.subr.bf16.mxu0 %v591_v0  ;;  %513 = vmatprep.subr.bf16.mxu1 %v591_v0  ;;  %v580_v8 = vld [vmem:[%s744_s3 + $0x18] sm:$0xff]   ;;  %v582_v10 = vld [vmem:[%s744_s3 + $0x20] sm:$0xff]   ;;  %v584_v12 = vld [vmem:[%s744_s3 + $0x28] sm:$0xff]  }
   0x5   :  { %v585_v13 = vld [vmem:[%s743_s2 + $0x30] sm:$0xff]   ;;  %v587_v15 = vld [vmem:[%s743_s2 + $0x38] sm:$0xff]   ;;  %v589_v17 = vld [vmem:[%s745_s0] sm:$0xff]  }
   0x6   :  { %v586_v14 = vld [vmem:[%s744_s3 + $0x30] sm:$0xff]   ;;  %v588_v16 = vld [vmem:[%s744_s3 + $0x38] sm:$0xff]   ;;  %v590_v18 = vld [vmem:[%s746_s1] sm:$0xff]  }
   0x7   :  { %494 = vmatpush3.bf16.msra.mxu0 %v575_v3  ;;  %514 = vmatpush3.bf16.msra.mxu1 %v576_v4  ;;  %v417_v20 = vld [vmem:[%s747_s4] ss:$0 sm:$0xff] }
   0x8   :  { %495 = vmatprep.subr.bf16.mxu0 %v591_v0  ;;  %515 = vmatprep.subr.bf16.mxu1 %v591_v0  ;;  %v418_v36 = vld [vmem:[%s749_s5] ss:$0 sm:$0xff] }
   0xb   :  { %496 = vmatpush3.bf16.msra.mxu0 %v577_v5  ;;  %516 = vmatpush3.bf16.msra.mxu1 %v578_v6 }
   0xc   :  { %497 = vmatprep.subr.bf16.mxu0 %v591_v0  ;;  %517 = vmatprep.subr.bf16.mxu1 %v591_v0 }
   0xf   :  { %498 = vmatpush3.bf16.msra.mxu0 %v579_v7  ;;  %518 = vmatpush3.bf16.msra.mxu1 %v580_v8 }
  0x10   :  { %499 = vmatprep.subr.bf16.mxu0 %v591_v0  ;;  %519 = vmatprep.subr.bf16.mxu1 %v591_v0 }
  0x13   :  { %500 = vmatpush3.bf16.msra.mxu0 %v581_v9  ;;  %520 = vmatpush3.bf16.msra.mxu1 %v582_v10 }
  0x14   :  { %501 = vmatprep.subr.bf16.mxu0 %v591_v0  ;;  %521 = vmatprep.subr.bf16.mxu1 %v591_v0 }
  0x17   :  { %502 = vmatpush3.bf16.msra.mxu0 %v583_v11  ;;  %522 = vmatpush3.bf16.msra.mxu1 %v584_v12 }
  0x18   :  { %503 = vmatprep.subr.bf16.mxu0 %v591_v0  ;;  %523 = vmatprep.subr.bf16.mxu1 %v591_v0 }
  0x1b   :  { %504 = vmatpush3.bf16.msra.mxu0 %v585_v13  ;;  %524 = vmatpush3.bf16.msra.mxu1 %v586_v14 }
  0x1c   :  { %505 = vmatprep.subr.bf16.mxu0 %v591_v0  ;;  %525 = vmatprep.subr.bf16.mxu1 %v591_v0 }
  0x1f   :  { %506 = vmatpush3.bf16.msra.mxu0 %v587_v15  ;;  %526 = vmatpush3.bf16.msra.mxu1 %v588_v16 }
  0x20   :  { %531 = vmatprep.subr.bf16.mxu0 %v591_v0  ;;  %551 = vmatprep.subr.bf16.mxu1 %v591_v0 }
  0x22   :  { %508 = vmatmul.mubr.bf16.vlgmr.msra.gmra.mrb[0].mxu0 %v589_v17  ;;  %528 = vmatmul.mubr.bf16.vlgmr.msra.gmra.mrb[0].mxu1 %v590_v18 }
  0x23   :  { %532 = vmatpush3.bf16.msra.mxu0 %v573_v1  ;;  %552 = vmatpush3.bf16.msra.mxu1 %v574_v2 }
  0x24   :  { %533 = vmatprep.subr.bf16.mxu0 %v591_v0  ;;  %553 = vmatprep.subr.bf16.mxu1 %v591_v0 }
  0x25   :  { %547 = vmatprep.mubr.msk.bf16.mxu0 %vm592_vm0, %v591_v0  ;;  %567 = vmatprep.mubr.msk.bf16.mxu1 %vm592_vm0, %v591_v0 }
  0x27   :  { %534 = vmatpush3.bf16.msra.mxu0 %v575_v3  ;;  %554 = vmatpush3.bf16.msra.mxu1 %v576_v4 }
  0x28   :  { %535 = vmatprep.subr.bf16.mxu0 %v591_v0  ;;  %555 = vmatprep.subr.bf16.mxu1 %v591_v0 }
  0x2b   :  { %536 = vmatpush3.bf16.msra.mxu0 %v577_v5  ;;  %556 = vmatpush3.bf16.msra.mxu1 %v578_v6 }
  0x2c   :  { %537 = vmatprep.subr.bf16.mxu0 %v591_v0  ;;  %557 = vmatprep.subr.bf16.mxu1 %v591_v0 }
  0x2f   :  { %538 = vmatpush3.bf16.msra.mxu0 %v579_v7  ;;  %558 = vmatpush3.bf16.msra.mxu1 %v580_v8 }
  0x30   :  { %539 = vmatprep.subr.bf16.mxu0 %v591_v0  ;;  %559 = vmatprep.subr.bf16.mxu1 %v591_v0 }
  0x33   :  { %540 = vmatpush3.bf16.msra.mxu0 %v581_v9  ;;  %560 = vmatpush3.bf16.msra.mxu1 %v582_v10 }
  0x34   :  { %541 = vmatprep.subr.bf16.mxu0 %v591_v0  ;;  %561 = vmatprep.subr.bf16.mxu1 %v591_v0 }
  0x37   :  { %542 = vmatpush3.bf16.msra.mxu0 %v583_v11  ;;  %562 = vmatpush3.bf16.msra.mxu1 %v584_v12 }
  0x38   :  { %543 = vmatprep.subr.bf16.mxu0 %v591_v0  ;;  %563 = vmatprep.subr.bf16.mxu1 %v591_v0 }
  0x3b   :  { %544 = vmatpush3.bf16.msra.mxu0 %v585_v13  ;;  %564 = vmatpush3.bf16.msra.mxu1 %v586_v14 }
  0x3c   :  { %545 = vmatprep.subr.bf16.mxu0 %v591_v0  ;;  %565 = vmatprep.subr.bf16.mxu1 %v591_v0 }
  0x3f   :  { %546 = vmatpush3.bf16.msra.mxu0 %v587_v15  ;;  %566 = vmatpush3.bf16.msra.mxu1 %v588_v16 }
  0x42   :  { %548 = vmatmul.mubr.bf16.vlgmr.msra.gmra.mrb[4].mxu0 %v590_v18  ;;  %568 = vmatmul.mubr.bf16.vlgmr.msra.gmra.mrb[4].mxu1 %v589_v17 }
  0xf5   :  { %v174_v19 = vpop.f32.mrb[0].mxu0  ;;  %v269_v21 = vpop.f32.mrb[0].mxu1 }
  0xf6   :  { %v509_v22 = vpop.f32.mrb[1].mxu0  ;;  %v276_v23 = vsub.f32 %v174_v19, %v269_v21  ;;  %v529_v24 = vpop.f32.mrb[1].mxu1 }
  0xf7   :  { %v177_v25 = vpop.f32.mrb[2].mxu0  ;;  %v272_v26 = vpop.f32.mrb[2].mxu1 }
  0xf8   :  { %v510_v27 = vpop.f32.mrb[3].mxu0  ;;  %v278_v28 = vadd.f32 %v417_v20, %v276_v23  ;;  %v277_v29 = vsub.f32 %v177_v25, %v272_v26  ;;  %v530_v30 = vpop.f32.mrb[3].mxu1 }
  0xfa   :  { %vm375_vm1 = vcmp.ge.f32.partialorder %v278_v28, 0.0  ;;  %v279_v31 = vadd.f32 %v417_v20, %v277_v29 }
  0xfb   :  { %v437_v32 = vsel %vm375_vm1, 1.0, %v591_v0 }
  0xfc   :  { %vm376_vm2 = vcmp.ge.f32.partialorder %v279_v31, 0.0 }
  0xfd   :  { %v438_v33 = vsel %vm376_vm2, 1.0, %v591_v0 }
  0xfe   :  { %v450_v34 = vpack.c.bf16 %v438_v33, %v437_v32 }
 0x100   :  { %451 = vst [vmem:[%s748_s6] sm:$0xff] %v450_v34  }
 0x115   :  { %v318_v35 = vpop.f32.mrb[4].mxu0  ;;  %v359_v37 = vpop.f32.mrb[4].mxu1 }
 0x116   :  { %v549_v38 = vpop.f32.mrb[5].mxu0  ;;  %v360_v39 = vadd.f32 %v359_v37, %v318_v35  ;;  %v569_v40 = vpop.f32.mrb[5].mxu1 }
 0x117   :  { %v321_v41 = vpop.f32.mrb[6].mxu0  ;;  %v362_v42 = vpop.f32.mrb[6].mxu1 }
 0x118   :  { %v550_v43 = vpop.f32.mrb[7].mxu0  ;;  %v366_v44 = vadd.f32 %v418_v36, %v360_v39  ;;  %v363_v45 = vadd.f32 %v362_v42, %v321_v41  ;;  %v570_v46 = vpop.f32.mrb[7].mxu1 }
 0x11a   :  { %vm393_vm3 = vcmp.ge.f32.partialorder %v366_v44, 0.0  ;;  %v367_v47 = vadd.f32 %v418_v36, %v363_v45 }
 0x11b   :  { %v441_v48 = vsel %vm393_vm3, 1.0, %v591_v0 }
 0x11c   :  { %vm394_vm4 = vcmp.ge.f32.partialorder %v367_v47, 0.0 }
 0x11d   :  { %v442_v49 = vsel %vm394_vm4, 1.0, %v591_v0 }
 0x11e   :  { %v453_v50 = vpack.c.bf16 %v442_v49, %v441_v48 }
 0x120   :  { %454 = vst [vmem:[%s750_s7] sm:$0xff] %v453_v50  }

</bundles_post_ra>
